<compile_context>
chip_gen: v7x
topology: tpu7x:2x2x1
jax: 0.10.0
libtpu: 0.0.40
codegen_flags: <defaults>
</compile_context>

<pallas_src>
import functools
import math

import jax
import jax.numpy as jnp
from jax.experimental import pallas as pl
from jax.experimental.pallas import tpu as pltpu


# ----------------------------- toy config ---------------------------------
# Small but (8,128)-aligned: lane axes are multiples of 128, sublane axes
# multiples of 8.  (Full GPT-2: vocab=50304, block=1024, layers=12, heads=12,
# n_embd=768, head size 64 — head size here matches the real model.)
VOCAB = 512
BLOCK_SIZE = 128
N_LAYER = 2
N_HEAD = 2
N_EMBD = 128
HS = N_EMBD // N_HEAD            # 64
B = 2
T = 128
EPS = 1e-5

ROW_TILE = 128                   # rows per grid step (>=2 steps keeps v7x's 2 TCs busy)
V_TILE = 512                     # vocab tile for the lm_head kernel
VMEM_LIMIT = 32 * 1024 * 1024    # raised scoped-VMEM limit

BF16 = jnp.bfloat16


def _layernorm(x, w, b):
    mu = jnp.mean(x, axis=-1, keepdims=True)
    var = jnp.mean((x - mu) ** 2, axis=-1, keepdims=True)
    return (x - mu) * jax.lax.rsqrt(var + EPS) * w + b


def _gelu_tanh(x):
    # nn.GELU(approximate='tanh')
    return 0.5 * x * (1.0 + jnp.tanh(math.sqrt(2.0 / math.pi) * (x + 0.044715 * x * x * x)))


# ----------------------- kernel 1: LN1 + QKV projection --------------------
def ln_qkv_kernel(x_ref, lnw_ref, lnb_ref, wqkv_ref, bqkv_ref, out_ref):
    xn = _layernorm(x_ref[...], lnw_ref[0], lnb_ref[0])                   # f32
    qkv = jnp.dot(xn.astype(BF16), wqkv_ref[...],
                  preferred_element_type=jnp.float32) + bqkv_ref[0]
    out_ref[...] = qkv.astype(out_ref.dtype)                              # bf16 store


def run_ln_qkv(x, layer):
    nr, c = x.shape
    const = lambda a: pl.BlockSpec(a.shape, lambda i: (0,) * a.ndim)
    return pl.pallas_call(
        ln_qkv_kernel,
        out_shape=jax.ShapeDtypeStruct((nr, 3 * c), BF16),
        grid=(nr // ROW_TILE,),
        in_specs=[
            pl.BlockSpec((ROW_TILE, c), lambda i: (i, 0)),
            const(layer["ln1_w"]), const(layer["ln1_b"]),
            const(layer["w_qkv"]), const(layer["b_qkv"]),
        ],
        out_specs=pl.BlockSpec((ROW_TILE, 3 * c), lambda i: (i, 0)),
        compiler_params=pltpu.CompilerParams(
            dimension_semantics=("parallel",), vmem_limit_bytes=VMEM_LIMIT),
    )(x, layer["ln1_w"], layer["ln1_b"], layer["w_qkv"], layer["b_qkv"])


# ----------------------- kernel 2: causal attention -------------------------
# One grid step per batch element: all N_HEAD heads are processed back-to-back
# (amortizes MXU fill/drain) and the merged (T, C) output tile is lane-dense.
def attn_kernel(qkv_ref, o_ref, *, scale):
    qkv = qkv_ref[...]                                                    # (T, 3C) bf16
    t = qkv.shape[0]
    c = qkv.shape[1] // 3
    row = jax.lax.broadcasted_iota(jnp.int32, (t, t), 0)
    col = jax.lax.broadcasted_iota(jnp.int32, (t, t), 1)
    causal = col <= row
    outs = []
    for h in range(N_HEAD):                                               # static unroll
        q = qkv[:, h * HS:(h + 1) * HS]                                   # (T, hs) bf16
        k = qkv[:, c + h * HS: c + (h + 1) * HS]
        v = qkv[:, 2 * c + h * HS: 2 * c + (h + 1) * HS]
        # scores = q @ k^T without explicit transpose: contract last dims.
        s = jax.lax.dot_general(q, k, (((1,), (1,)), ((), ())),
                                preferred_element_type=jnp.float32) * scale
        s = jnp.where(causal, s, -1e30)                                   # finite mask
        p = jnp.exp(s - jnp.max(s, axis=-1, keepdims=True))
        p = p * pl.reciprocal(jnp.sum(p, axis=-1, keepdims=True), approx=True)
        outs.append(jnp.dot(p.astype(BF16), v, preferred_element_type=jnp.float32))
    o_ref[...] = jnp.concatenate(outs, axis=-1).astype(o_ref.dtype)       # (T, C) bf16


def run_attention(qkv, bn, tn):
    c3 = qkv.shape[1]
    c = c3 // 3
    return pl.pallas_call(
        functools.partial(attn_kernel, scale=1.0 / math.sqrt(HS)),
        out_shape=jax.ShapeDtypeStruct((bn * tn, c), BF16),
        grid=(bn,),
        in_specs=[pl.BlockSpec((tn, c3), lambda b: (b, 0))],
        out_specs=pl.BlockSpec((tn, c), lambda b: (b, 0)),
        compiler_params=pltpu.CompilerParams(
            dimension_semantics=("parallel",), vmem_limit_bytes=VMEM_LIMIT),
    )(qkv)


# -------------- kernel 3: attn proj + residual + LN2 + MLP + residual -------
def proj_mlp_kernel(x_ref, y_ref, wpr_ref, bpr_ref, ln2w_ref, ln2b_ref,
                    wfc_ref, bfc_ref, wpr2_ref, bpr2_ref, out_ref):
    x = x_ref[...]                                                        # (R, C) f32
    x = x + jnp.dot(y_ref[...], wpr_ref[...],                             # y already bf16
                    preferred_element_type=jnp.float32) + bpr_ref[0]      # residual 1
    xn = _layernorm(x, ln2w_ref[0], ln2b_ref[0])
    h = jnp.dot(xn.astype(BF16), wfc_ref[...],
                preferred_element_type=jnp.float32) + bfc_ref[0]
    h = _gelu_tanh(h)
    out_ref[...] = x + jnp.dot(h.astype(BF16), wpr2_ref[...],
                               preferred_element_type=jnp.float32) + bpr2_ref[0]


def run_proj_mlp(x, y, layer):
    nr, c = x.shape
    const = lambda a: pl.BlockSpec(a.shape, lambda i: (0,) * a.ndim)
    row = pl.BlockSpec((ROW_TILE, c), lambda i: (i, 0))
    return pl.pallas_call(
        proj_mlp_kernel,
        out_shape=jax.ShapeDtypeStruct((nr, c), jnp.float32),
        grid=(nr // ROW_TILE,),
        in_specs=[
            row, row,
            const(layer["w_proj"]), const(layer["b_proj"]),
            const(layer["ln2_w"]), const(layer["ln2_b"]),
            const(layer["w_fc"]), const(layer["b_fc"]),
            const(layer["w_proj2"]), const(layer["b_proj2"]),
        ],
        out_specs=row,
        compiler_params=pltpu.CompilerParams(
            dimension_semantics=("parallel",), vmem_limit_bytes=VMEM_LIMIT),
    )(x, y, layer["w_proj"], layer["b_proj"], layer["ln2_w"], layer["ln2_b"],
      layer["w_fc"], layer["b_fc"], layer["w_proj2"], layer["b_proj2"])


# -------------------- kernel 4: final LN + vocab-tiled lm_head ---------------
# Final LN is computed once per row tile (at vocab-tile j == 0) into a VMEM
# scratch and reused across vocab tiles — no per-tile LN recompute.
def head_kernel(x_ref, lnfw_ref, lnfb_ref, wte_ref, out_ref, xn_ref):
    @pl.when(pl.program_id(1) == 0)
    def _():
        xn_ref[...] = _layernorm(x_ref[...], lnfw_ref[0], lnfb_ref[0]).astype(BF16)
    # logits = xn @ wte^T without materializing the transpose.
    out_ref[...] = jax.lax.dot_general(
        xn_ref[...], wte_ref[...], (((1,), (1,)), ((), ())),
        preferred_element_type=jnp.float32)


def run_head(x, lnf_w, lnf_b, wte):
    nr, c = x.shape
    v = wte.shape[0]
    vt = min(V_TILE, v)
    return pl.pallas_call(
        head_kernel,
        out_shape=jax.ShapeDtypeStruct((nr, v), jnp.float32),
        grid=(nr // ROW_TILE, v // vt),
        in_specs=[
            pl.BlockSpec((ROW_TILE, c), lambda i, j: (i, 0)),
            pl.BlockSpec(lnf_w.shape, lambda i, j: (0, 0)),
            pl.BlockSpec(lnf_b.shape, lambda i, j: (0, 0)),
            pl.BlockSpec((vt, c), lambda i, j: (j, 0)),
        ],
        out_specs=pl.BlockSpec((ROW_TILE, vt), lambda i, j: (i, j)),
        scratch_shapes=[pltpu.VMEM((ROW_TILE, c), BF16)],
        compiler_params=pltpu.CompilerParams(
            dimension_semantics=("parallel", "arbitrary"),
            vmem_limit_bytes=VMEM_LIMIT),
    )(x, lnf_w, lnf_b, wte)


# ------------------------------- parameters -------------------------------
def init_params(key):
    std = 0.02
    proj_std = 0.02 * (2 * N_LAYER) ** (-0.5)     # NANOGPT_SCALE_INIT layers
    keys = iter(jax.random.split(key, 8 + 8 * N_LAYER))
    nrm = lambda k, shape, s, dt: (s * jax.random.normal(k, shape)).astype(dt)

    params = {
        "wte": nrm(next(keys), (VOCAB, N_EMBD), std, BF16),
        "wpe": nrm(next(keys), (BLOCK_SIZE, N_EMBD), std, jnp.float32),
        "lnf_w": jnp.ones((1, N_EMBD), jnp.float32),
        "lnf_b": jnp.zeros((1, N_EMBD), jnp.float32),
        "layers": [],
    }
    for _ in range(N_LAYER):
        layer = {
            "ln1_w": jnp.ones((1, N_EMBD), jnp.float32),
            "ln1_b": jnp.zeros((1, N_EMBD), jnp.float32),
            # stored as (in, out) = W.T of torch's (out, in); normal init is isotropic
            "w_qkv": nrm(next(keys), (N_EMBD, 3 * N_EMBD), std, BF16),
            "b_qkv": jnp.zeros((1, 3 * N_EMBD), jnp.float32),
            "w_proj": nrm(next(keys), (N_EMBD, N_EMBD), proj_std, BF16),
            "b_proj": jnp.zeros((1, N_EMBD), jnp.float32),
            "ln2_w": jnp.ones((1, N_EMBD), jnp.float32),
            "ln2_b": jnp.zeros((1, N_EMBD), jnp.float32),
            "w_fc": nrm(next(keys), (N_EMBD, 4 * N_EMBD), std, BF16),
            "b_fc": jnp.zeros((1, 4 * N_EMBD), jnp.float32),
            "w_proj2": nrm(next(keys), (4 * N_EMBD, N_EMBD), proj_std, BF16),
            "b_proj2": jnp.zeros((1, N_EMBD), jnp.float32),
        }
        params["layers"].append(layer)
    return params


# ------------------------------ full forward ------------------------------
def gpt_forward(idx, params):
    """idx: (B, T) int32 token ids -> logits (B, T, VOCAB)."""
    bn, tn = idx.shape
    assert tn <= BLOCK_SIZE
    assert (bn * tn) % ROW_TILE == 0 and VOCAB % min(V_TILE, VOCAB) == 0
    # TODO(synk): embedding gather is data-dependent indexing; kept in plain JAX.
    tok_emb = params["wte"][idx].astype(jnp.float32)        # (B, T, C)
    pos_emb = params["wpe"][:tn].astype(jnp.float32)        # (T, C)
    x = (tok_emb + pos_emb[None]).reshape(bn * tn, N_EMBD)  # (B*T, C) residual stream
    for layer in params["layers"]:
        qkv = run_ln_qkv(x, layer)                          # (B*T, 3C) bf16
        y = run_attention(qkv, bn, tn)                      # (B*T, C)  bf16, lane-dense
        x = run_proj_mlp(x, y, layer)                       # (B*T, C)  f32
    logits = run_head(x, params["lnf_w"], params["lnf_b"], params["wte"])
    return logits.reshape(bn, tn, VOCAB)


# --------------------------- pure-JAX reference ---------------------------
def gpt_forward_ref(idx, params):
    bn, tn = idx.shape
    x = params["wte"][idx].astype(jnp.float32) + params["wpe"][:tn][None].astype(jnp.float32)
    for L in params["layers"]:
        xn = _layernorm(x, L["ln1_w"][0], L["ln1_b"][0])
        qkv = jnp.dot(xn.astype(BF16), L["w_qkv"],
                      preferred_element_type=jnp.float32) + L["b_qkv"][0]
        q, k, v = jnp.split(qkv, 3, axis=-1)
        q = q.reshape(bn, tn, N_HEAD, HS).transpose(0, 2, 1, 3)
        k = k.reshape(bn, tn, N_HEAD, HS).transpose(0, 2, 1, 3)
        v = v.reshape(bn, tn, N_HEAD, HS).transpose(0, 2, 1, 3)
        att = jnp.einsum("bhqd,bhkd->bhqk", q.astype(BF16), k.astype(BF16),
                         preferred_element_type=jnp.float32) / math.sqrt(HS)
        mask = jnp.tril(jnp.ones((tn, tn), bool))
        att = jnp.where(mask, att, -1e30)
        att = jax.nn.softmax(att, axis=-1)
        y = jnp.einsum("bhqk,bhkd->bhqd", att.astype(BF16), v.astype(BF16),
                       preferred_element_type=jnp.float32)
        y = y.transpose(0, 2, 1, 3).reshape(bn, tn, N_EMBD)
        x = x + jnp.dot(y.astype(BF16), L["w_proj"],
                        preferred_element_type=jnp.float32) + L["b_proj"][0]
        xn2 = _layernorm(x, L["ln2_w"][0], L["ln2_b"][0])
        h = _gelu_tanh(jnp.dot(xn2.astype(BF16), L["w_fc"],
                               preferred_element_type=jnp.float32) + L["b_fc"][0])
        x = x + jnp.dot(h.astype(BF16), L["w_proj2"],
                        preferred_element_type=jnp.float32) + L["b_proj2"][0]
    xn = _layernorm(x, params["lnf_w"][0], params["lnf_b"][0])
    return jnp.einsum("btc,vc->btv", xn.astype(BF16), params["wte"],
                      preferred_element_type=jnp.float32)


if __name__ == "__main__":
    key = jax.random.PRNGKey(0)
    kp, ki = jax.random.split(key)
    params = init_params(kp)
    idx = jax.random.randint(ki, (B, T), 0, VOCAB, dtype=jnp.int32)

    logits = gpt_forward(idx, params)
    logits = jax.block_until_ready(logits)

    ref = gpt_forward_ref(idx, params)
    ref = jax.block_until_ready(ref)

    assert logits.shape == (B, T, VOCAB)
    max_err = float(jnp.max(jnp.abs(logits - ref)))
    assert max_err < 2e-2, f"mismatch vs reference, max_err={max_err}"

    print("KERNEL_OK")
</pallas_src>

<mosaic_0001>
module attributes {stable_mosaic.version = 11 : i64} {
  func.func @ln_qkv_kernel(%arg0: i32, %arg1: memref<128x128xf32, #tpu.memory_space<vmem>>, %arg2: memref<1x128xf32, #tpu.memory_space<vmem>>, %arg3: memref<1x128xf32, #tpu.memory_space<vmem>>, %arg4: memref<128x384xbf16, #tpu.memory_space<vmem>>, %arg5: memref<1x384xf32, #tpu.memory_space<vmem>>, %arg6: memref<128x384xbf16, #tpu.memory_space<vmem>>) attributes {dimension_semantics = [#tpu.dimension_semantics<parallel>], iteration_bounds = array<i64: 2>, scalar_prefetch = 0 : i64, scratch_operands = 0 : i64, tpu.core_type = #tpu.core_type<tc>, window_params = [{transform_indices = @transform_0, window_bounds = array<i64: 128, 128>}, {pipeline_mode = #tpu.pipeline_mode<synchronous>, transform_indices = @transform_1, window_bounds = array<i64: 1, 128>}, {pipeline_mode = #tpu.pipeline_mode<synchronous>, transform_indices = @transform_2, window_bounds = array<i64: 1, 128>}, {pipeline_mode = #tpu.pipeline_mode<synchronous>, transform_indices = @transform_3, window_bounds = array<i64: 128, 384>}, {pipeline_mode = #tpu.pipeline_mode<synchronous>, transform_indices = @transform_4, window_bounds = array<i64: 1, 384>}, {transform_indices = @transform_5, window_bounds = array<i64: 128, 384>}]} {
    %c0 = arith.constant 0 : index
    %c0_0 = arith.constant 0 : index
    %0 = vector.load %arg1[%c0, %c0_0] : memref<128x128xf32, #tpu.memory_space<vmem>>, vector<128x128xf32>
    %c0_1 = arith.constant 0 : index
    %c0_2 = arith.constant 0 : index
    %1 = vector.load %arg2[%c0_1, %c0_2] : memref<1x128xf32, #tpu.memory_space<vmem>>, vector<1x128xf32>
    %2 = vector.shape_cast %1 : vector<1x128xf32> to vector<128xf32>
    %c0_3 = arith.constant 0 : index
    %c0_4 = arith.constant 0 : index
    %3 = vector.load %arg3[%c0_3, %c0_4] : memref<1x128xf32, #tpu.memory_space<vmem>>, vector<1x128xf32>
    %4 = vector.shape_cast %3 : vector<1x128xf32> to vector<128xf32>
    %cst = arith.constant dense<0.000000e+00> : vector<128xf32>
    %5 = vector.multi_reduction <add>, %0, %cst [1] : vector<128x128xf32> to vector<128xf32>
    %6 = vector.shape_cast %5 : vector<128xf32> to vector<128x1xf32>
    %cst_5 = arith.constant 1.280000e+02 : f32
    %7 = vector.broadcast %cst_5 : f32 to vector<128x1xf32>
    %8 = arith.divf %6, %7 : vector<128x1xf32>
    %9 = vector.broadcast %8 : vector<128x1xf32> to vector<128x128xf32>
    %10 = arith.subf %0, %9 : vector<128x128xf32>
    %11 = arith.mulf %10, %10 : vector<128x128xf32>
    %cst_6 = arith.constant dense<0.000000e+00> : vector<128xf32>
    %12 = vector.multi_reduction <add>, %11, %cst_6 [1] : vector<128x128xf32> to vector<128xf32>
    %13 = vector.shape_cast %12 : vector<128xf32> to vector<128x1xf32>
    %cst_7 = arith.constant 1.280000e+02 : f32
    %14 = vector.broadcast %cst_7 : f32 to vector<128x1xf32>
    %15 = arith.divf %13, %14 : vector<128x1xf32>
    %16 = vector.broadcast %8 : vector<128x1xf32> to vector<128x128xf32>
    %17 = arith.subf %0, %16 : vector<128x128xf32>
    %cst_8 = arith.constant 9.99999974E-6 : f32
    %18 = vector.broadcast %cst_8 : f32 to vector<128x1xf32>
    %19 = arith.addf %15, %18 : vector<128x1xf32>
    %20 = math.rsqrt %19 : vector<128x1xf32>
    %21 = vector.broadcast %20 : vector<128x1xf32> to vector<128x128xf32>
    %22 = arith.mulf %17, %21 : vector<128x128xf32>
    %23 = vector.shape_cast %2 : vector<128xf32> to vector<1x128xf32>
    %24 = vector.broadcast %23 : vector<1x128xf32> to vector<128x128xf32>
    %25 = arith.mulf %22, %24 : vector<128x128xf32>
    %26 = vector.shape_cast %4 : vector<128xf32> to vector<1x128xf32>
    %27 = vector.broadcast %26 : vector<1x128xf32> to vector<128x128xf32>
    %28 = arith.addf %25, %27 : vector<128x128xf32>
    %29 = arith.truncf %28 : vector<128x128xf32> to vector<128x128xbf16>
    %c0_9 = arith.constant 0 : index
    %c0_10 = arith.constant 0 : index
    %30 = vector.load %arg4[%c0_9, %c0_10] : memref<128x384xbf16, #tpu.memory_space<vmem>>, vector<128x384xbf16>
    %cst_11 = arith.constant dense<0.000000e+00> : vector<128x384xf32>
    %31 = tpu.matmul %29, %30, %cst_11 {dimension_numbers = #tpu.dot_dimension_numbers<[1], [0], [0], [1], [0, 0, 1, 1], [], []>} : vector<128x128xbf16>, vector<128x384xbf16>, vector<128x384xf32> -> vector<128x384xf32>
    %c0_12 = arith.constant 0 : index
    %c0_13 = arith.constant 0 : index
    %32 = vector.load %arg5[%c0_12, %c0_13] : memref<1x384xf32, #tpu.memory_space<vmem>>, vector<1x384xf32>
    %33 = vector.shape_cast %32 : vector<1x384xf32> to vector<384xf32>
    %34 = vector.shape_cast %33 : vector<384xf32> to vector<1x384xf32>
    %35 = vector.broadcast %34 : vector<1x384xf32> to vector<128x384xf32>
    %36 = arith.addf %31, %35 : vector<128x384xf32>
    %37 = arith.truncf %36 : vector<128x384xf32> to vector<128x384xbf16>
    %c0_14 = arith.constant 0 : index
    %c0_15 = arith.constant 0 : index
    %38 = vector.load %arg6[%c0_14, %c0_15] : memref<128x384xbf16, #tpu.memory_space<vmem>>, vector<128x384xbf16>
    tpu.vector_store %arg6[%c0_14, %c0_15], %37 {strides = array<i32>} : memref<128x384xbf16, #tpu.memory_space<vmem>>, vector<128x384xbf16>,
    return
  }
  func.func @transform_0(%arg0: i32) -> (i32, i32) {
    %c0_i32 = arith.constant 0 : i32
    %c0_i32_0 = arith.constant 0 : i32
    return %arg0, %c0_i32 : i32, i32
  }
  func.func @transform_1(%arg0: i32) -> (i32, i32) {
    %c0_i32 = arith.constant 0 : i32
    %c0_i32_0 = arith.constant 0 : i32
    %c0_i32_1 = arith.constant 0 : i32
    return %c0_i32, %c0_i32_0 : i32, i32
  }
  func.func @transform_2(%arg0: i32) -> (i32, i32) {
    %c0_i32 = arith.constant 0 : i32
    %c0_i32_0 = arith.constant 0 : i32
    %c0_i32_1 = arith.constant 0 : i32
    return %c0_i32, %c0_i32_0 : i32, i32
  }
  func.func @transform_3(%arg0: i32) -> (i32, i32) {
    %c0_i32 = arith.constant 0 : i32
    %c0_i32_0 = arith.constant 0 : i32
    %c0_i32_1 = arith.constant 0 : i32
    return %c0_i32, %c0_i32_0 : i32, i32
  }
  func.func @transform_4(%arg0: i32) -> (i32, i32) {
    %c0_i32 = arith.constant 0 : i32
    %c0_i32_0 = arith.constant 0 : i32
    %c0_i32_1 = arith.constant 0 : i32
    return %c0_i32, %c0_i32_0 : i32, i32
  }
  func.func @transform_5(%arg0: i32) -> (i32, i32) {
    %c0_i32 = arith.constant 0 : i32
    %c0_i32_0 = arith.constant 0 : i32
    return %arg0, %c0_i32 : i32, i32
  }
}

</mosaic_0001>

<bundles_post_ra>
// kernel: tpu_custom_call.1
= control target key start
LH: loop header
LB: loop body
LE: loop exit
PB: predicated region body
PF: predicated region fallthrough
CT: control target
= control target key end

     0   :  { %10 = vsyncpa [#allocation3], 0  ;;  %s2117_s0 = inlined_call_operand.hbm [shape: f32[256,128], index: 0, kind: input, shape index: {}]   ;;  %s2118_s1 = inlined_call_operand.vmem [shape: f32[1,128], index: 1, kind: input, shape index: {}]   ;;  %s2119_s2 = inlined_call_operand.vmem [shape: f32[1,128], index: 2, kind: input, shape index: {}]   ;;  %s2120_s3 = inlined_call_operand.hbm [shape: bf16[128,384], index: 3, kind: input, shape index: {}]   ;;  %s2121_s4 = inlined_call_operand.vmem [shape: f32[1,384], index: 4, kind: input, shape index: {}]   ;;  %s2122_s5 = inlined_call_operand.hbm [shape: bf16[256,384], index: 5, kind: output, shape index: {}]  }
   0x1   :  { %12 = vsyncpa [#allocation3 + $0x1], 0 }
   0x2   :  { %13 = vsyncpa [#allocation6], 0 }
   0x3   :  { %14 = vsyncpa [#allocation4], 0 }
   0x4   :  { %16 = vsyncpa [#allocation4 + $0x1], 0  ;;  %s1639_s18 = smov 0   ;;  %s1641_s19 = smov 0  }
   0x5   :  { %s1643_s20 = smov 0   ;;  %s1645_s21 = smov 0  }
   0x6 LB: > { %s1660_s22 = sadd.s32 4294967295, %s1597_s21   ;;  %s1185_s23 = sadd.s32 4294967294, %s1597_s21   ;;  %s1597_s21 = sphi %s1645_s21, %s2142_s21   ;;  %s1593_s20 = sphi %s1643_s20, %s2141_s20   ;;  %s1589_s19 = sphi %s1641_s19, %s2140_s19   ;;  %s1585_s18 = sphi %s1639_s18, %s2139_s18  }
   0x7   : > { %p42_p0 = scmp.ne.s32.totalorder %s1589_s19, %s1585_s18  ;;  %p2123_p1 = scmp.eq.s32.totalorder %s1660_s22, 0 }
   0x8   : > { %p156_p3 = scmp.eq.s32.totalorder %s1185_s23, 1  ;;  %p1186_p5 = scmp.ge.s32.totalorder %s1597_s21, 1 }
   0x9   : > { %p1669_p4 = por %p2123_p1, %p42_p0  ;;  %p163_p7 = scmp.lt.s32.totalorder %s1597_s21, 3 }
   0xa   : > { %p1674_p6 = por %p156_p3, %p42_p0  ;;  %s1599_s27 = smov [#allocation5]  }
   0xb   : > { %s2126_s24 = scalar_select %p1669_p4, 1, 0 }
   0xc   : > { %s2127_s25 = scalar_select %p1674_p6, 1, 0 }
   0xd   : > { %p1679_p8 = pnand %p1186_p5, %p163_p7  ;;  %s181_s28 = sshll.u32 %s1599_s27, 4  ;;  %s1683_s28 = int_to_ptr.vmem [resolvable:$true] %s181_s28 }
   0xe   : > { %s1695_s30 = sadd.s32 1, %s1597_s21   ;;  %s29_s6 = sadd.s32 1, %s1593_s20 }
   0xf   : > { %s2128_s26 = scalar_select %p1679_p8, 1, 0 }
  0x10   : > { %p1349_p9 = pneg %p1679_p8  ;;  %s26_s7 = ssub.s32 %s1597_s21, %s1695_s30 }
  0x11   : > { %s1469_s10 = scalar_lea.hbm %s2120_s3, 3072 }
  0x12   : > { %p1690_p11 = pnand %p1349_p9, %p2123_p1  ;;  %p1470_p12 = scmp.ne.s32.totalorder %s2120_s3, %s1469_s10 }
  0x13   : > { %p1476_p5 = scmp.lt.u32.totalorder %s1469_s10, %s2120_s3 }
  0x14   : > { %p1471_p13 = pneg %p1690_p11 }
  0x16   : > { %p1472_p0 = pnand %p1471_p13, %p1470_p12 }
  0x18   : > { %p1473_p3 = pneg %p1472_p0 }
  0x1a   : > { %p1478_p7 = pnand %p1476_p5, %p1473_p3 }
  0x1c   : > { %1481 = shalt.err (!%p1478_p7)
}
  0x1d   : > { %s1482_s15 = scalar_lea.vmem %s1683_s28, 3072  ;;  %p1490_p2 = scmp.lt.s32.totalorder %s1683_s28, %s1683_s28 }
  0x1e   : > { %p1483_p9 = scmp.ne.s32.totalorder %s1683_s28, %s1482_s15  ;;  %p1491_p6 = scmp.lt.s32.totalorder %s1482_s15, %s1482_s15 }
  0x20   : > { %p1485_p10 = pnand %p1483_p9, %p1471_p13  ;;  %p1492_p4 = por %p1491_p6, %p1490_p2 }
  0x22   : > { %p1486_p1 = pneg %p1485_p10 }
  0x24   : > { %p1493_p8 = pnand %p1492_p4, %p1486_p1 }
  0x26   : > { %1496 = shalt.err (!%p1493_p8)
}
  0x27   : > { %s1600_s16 = smov 192   ;;  %s1601_s17 = smov 12  }
  0x28   : > { %1352 = dma.hbm_to_vmem [thread:$0]  (!%p1690_p11), %s2120_s3, 3072, %s1683_s28, [#allocation6], %s1600_s16, %s1600_s16, %s1601_s17  }
  0x29   : > { %p27_p2 = scmp.eq.s32.totalorder %s26_s7, 0  ;;  %p36_p1 = scmp.ne.s32.totalorder %s1593_s20, %s1589_s19 }
  0x2a   : > { %p37_p4 = scmp.eq.s32.totalorder %s1597_s21, 0  ;;  %p1362_p6 = scmp.lt.s32.totalorder %s1597_s21, 2 }
  0x2b   : > { %s1726_s8 = scalar_select %p27_p2, %s1593_s20, %s29_s6  }
  0x2c   : > { %p38_p8 = por %p37_p4, %p36_p1  ;;  %p2130_p10 = scmp.eq.s32.totalorder %s1660_s22, 1 }
  0x2d   : > { %s198_s10 = sand.u32 1, %s1593_s20   ;;  %s1258_s11 = sshll.u32 %s1597_s21, 11 }
  0x2e   : > { %p1730_p12 = por %p2130_p10, %p36_p1  ;;  %s1189_s12 = sshll.u32 %s198_s10, 7 }
  0x2f   : > { %s1739_s14 = scalar_lea.hbm %s2117_s0, %s1258_s11  ;;  %s202_s28 = scalar_lea.vmem [#allocation2], %s1189_s12 }
  0x30   : > { %s209_s6 = sshll.u32 %s202_s28, 4  ;;  %p1741_p11 = pnand %p1362_p6, %p38_p8  ;;  %s1745_s6 = int_to_ptr.vmem [resolvable:$true] %s209_s6 }
  0x31   : > { %s1747_s15 = scalar_lea.sflag [#allocation3], %s198_s10  ;;  %s1497_s16 = scalar_lea.hbm %s1739_s14, 2048 }
  0x32   : > { %p1498_p13 = scmp.ne.s32.totalorder %s1739_s14, %s1497_s16  ;;  %p1499_p0 = pneg %p1741_p11 }
  0x33   : > { %s1502_s27 = scalar_lea.hbm %s2117_s0, 4096  ;;  %p1503_p7 = scmp.lt.u32.totalorder %s1739_s14, %s2117_s0 }
  0x34   : > { %p1500_p3 = pnand %p1499_p0, %p1498_p13  ;;  %p1504_p9 = scmp.lt.u32.totalorder %s1502_s27, %s1497_s16 }
  0x35   : > { %p1506_p1 = scmp.lt.u32.totalorder %s1497_s16, %s1739_s14 }
  0x36   : > { %p1501_p5 = pneg %p1500_p3  ;;  %p1505_p2 = por %p1504_p9, %p1503_p7 }
  0x38   : > { %p1507_p4 = por %p1506_p1, %p1505_p2 }
  0x3a   : > { %p1508_p6 = pnand %p1507_p4, %p1501_p5 }
  0x3c   : > { %1511 = shalt.err (!%p1508_p6)
}
  0x3d   : > { %s1512_s10 = scalar_lea.vmem %s1745_s6, 2048  ;;  %s1602_s29 = smov [#allocation2]  }
  0x3e   : > { %p1513_p8 = scmp.ne.s32.totalorder %s1745_s6, %s1512_s10  ;;  %s1517_s13 = sshll.u32 %s1602_s29, 4  ;;  %s1518_s13 = int_to_ptr.vmem [resolvable:$false] %s1517_s13 }
  0x3f   : > { %s1519_s28 = scalar_lea.vmem %s1518_s13, 4096  ;;  %p1520_p3 = scmp.lt.s32.totalorder %s1745_s6, %s1518_s13 }
  0x40   : > { %p1515_p10 = pnand %p1513_p8, %p1499_p0  ;;  %p1521_p7 = scmp.lt.s32.totalorder %s1519_s28, %s1512_s10 }
  0x42   : > { %p1516_p13 = pneg %p1515_p10  ;;  %p1522_p9 = por %p1521_p7, %p1520_p3 }
  0x44   : > { %p1523_p2 = pnand %p1522_p9, %p1516_p13 }
  0x46   : > { %1526 = shalt.err (!%p1523_p2)
}
  0x47   : > { %s1603_s16 = smov 128   ;;  %s1604_s17 = smov 8  }
  0x48   : > { %1356 = dma.hbm_to_vmem [thread:$0]  (!%p1741_p11), %s1739_s14, 2048, %s1745_s6, %s1747_s15, %s1603_s16, %s1603_s16, %s1604_s17  }
  0x49   : > { %p2133_p0 = scmp.ne.s32.totalorder %s2128_s26, 0 }
  0x4a   : > { %s1778_s23 = sand.u32 (!%p2133_p0), 1, %s1589_s19   ;;  %p2134_p5 = scmp.ne.s32.totalorder (!%p2133_p0), %s2126_s24, 0 }
  0x4b   : > { %221 = sbr.rel (%p2133_p0) target bundleno = 694 (0x2b6), region = 40  ;;  %s1193_s27 = sshll.u32 (!%p2133_p0), %s1778_s23, 7 }
  0x4c   : > { %s224_s11 = scalar_lea.sflag (!%p2133_p0), [#allocation3], %s1778_s23  ;;  %s1782_s12 = scalar_lea.vmem (!%p2133_p0), [#allocation2], %s1193_s27 }
  0x52   : > { %1572 = dma.done.wait (%p2134_p5), %s224_s11, 2048  }
  0x53   : > { %1574 = vsyncadd (%p2134_p5), %s224_s11, 4294965248  ;;  %p2135_p11 = scmp.eq.s32.totalorder %s1660_s22, 0 }
  0x55   : > { %1576 = dma.done.wait (%p2135_p11), [#allocation6], 3072   ;;  %p2136_p1 = pmov %p2135_p11 }
  0x56   : > { %v261_v0 = vld [vmem:[%s1782_s12] sm:$0xff]  ;;  %v263_v1 = vld [vmem:[%s1782_s12 + $0x10] sm:$0xff]  ;;  %v262_v2 = vld [vmem:[%s1782_s12 + $0x8] sm:$0xff]  ;;  %s1339_s10 = smul.u32 192, %s1778_s23 }
  0x57   : > { %1578 = vsyncadd (%p2136_p1), [#allocation6], 4294964224  ;;  %279 = vadd.xlane.f32.xlu0 %v261_v0  ;;  %283 = vadd.xlane.f32.xlu1 %v263_v1  ;;  %v264_v3 = vld [vmem:[%s1782_s12 + $0x18] sm:$0xff]  ;;  %v265_v4 = vld [vmem:[%s1782_s12 + $0x20] sm:$0xff]  ;;  %s1340_s13 = smul.u32 3072, %s1660_s22  ;;  %s1088_s22 = scalar_lea.sflag [#allocation4], %s1778_s23 }
  0x58   : > { %v266_v5 = vld [vmem:[%s1782_s12 + $0x28] sm:$0xff]  ;;  %v267_v6 = vld [vmem:[%s1782_s12 + $0x30] sm:$0xff]  ;;  %v1800_v7 = vld [vmem:[%s1782_s12 + $0x38] sm:$0xff]  ;;  %s1989_s29 = scalar_lea.vmem [#allocation7], %s1339_s10 }
  0x59   : > { %v1803_v8 = vld [vmem:[%s1782_s12 + $0x40] sm:$0xff]  ;;  %v1806_v9 = vld [vmem:[%s1782_s12 + $0x48] sm:$0xff]  ;;  %v1812_v10 = vld [vmem:[%s1782_s12 + $0x50] sm:$0xff]  ;;  %s1102_s28 = sshll.u32 %s1989_s29, 4  ;;  %s2069_s27 = scalar_lea.hbm %s2122_s5, %s1340_s13  ;;  %s2072_s28 = int_to_ptr.vmem [resolvable:$true] %s1102_s28 }
  0x5a   : > { %v1815_v11 = vld [vmem:[%s1782_s12 + $0x58] sm:$0xff]  ;;  %v1820_v12 = vld [vmem:[%s1782_s12 + $0x60] sm:$0xff]  ;;  %v1823_v13 = vld [vmem:[%s1782_s12 + $0x68] sm:$0xff]  ;;  %s1527_s11 = scalar_lea.vmem %s2072_s28, 3072 }
  0x5b   : > { %281 = vadd.xlane.f32.xlu0 %v262_v2  ;;  %285 = vadd.xlane.f32.xlu1 %v264_v3  ;;  %v1828_v14 = vld [vmem:[%s1782_s12 + $0x70] sm:$0xff]  ;;  %v1831_v15 = vld [vmem:[%s1782_s12 + $0x78] sm:$0xff]  ;;  %v1407_v17 = vld [vmem:[#allocation5] ss:$12 sps:$4 sm:$0xff]   ;;  %p1528_p4 = scmp.ne.s32.totalorder %s2072_s28, %s1527_s11  ;;  %s1606_s12 = smov [#allocation7]  }
  0x5c   : > { %v1405_v16 = vld [vmem:[#allocation5 + $0x4] ss:$12 sps:$4 sm:$0xff]   ;;  %v1408_v18 = vld [vmem:[#allocation5 + $0x1c] ss:$12 sps:$4 sm:$0xff]   ;;  %s1531_s24 = sshll.u32 %s1606_s12, 4  ;;  %s1532_s24 = int_to_ptr.vmem [resolvable:$false] %s1531_s24 }
  0x5d   : > { %v1410_v19 = vld [vmem:[#allocation5 + $0x8] ss:$12 sps:$4 sm:$0xff]   ;;  %685 = vmatprep.subr.bf16.mxu0 %v1405_v16  ;;  %v1411_v58 = vld [vmem:[#allocation5 + $0x18] ss:$12 sps:$4 sm:$0xff]   ;;  %p1529_p6 = pnand %p1528_p4, %p1730_p12  ;;  %s1533_s26 = scalar_lea.vmem %s1532_s24, 6144 }
  0x5e   : > { %686 = vmatpush1.bf16.msra.mxu0 %v1407_v17  ;;  %1307 = vmatprep.subr.bf16.mxu1 %v1410_v19  ;;  %p1534_p10 = scmp.lt.s32.totalorder %s2072_s28, %s1532_s24  ;;  %p1535_p13 = scmp.lt.s32.totalorder %s1533_s26, %s1527_s11 }
  0x5f   : > { %287 = vadd.xlane.f32.xlu0 %v265_v4  ;;  %289 = vadd.xlane.f32.xlu1 %v266_v5  ;;  %p1530_p8 = pneg %p1529_p6 }
  0x60   : > { %687 = vmatprep.subr.bf16.mxu0 %v1408_v18  ;;  %1308 = vmatpush3.bf16.msra.mxu1 %v1410_v19  ;;  %v1416_v18 = vld [vmem:[#allocation5 + $0x4c] ss:$12 sps:$4 sm:$0xff]   ;;  %p1536_p3 = por %p1535_p13, %p1534_p10 }
  0x61   : > { %v1418_v19 = vld [vmem:[#allocation5 + $0x38] ss:$12 sps:$4 sm:$0xff]  }
  0x62   : > { %688 = vmatpush1.bf16.msra.mxu0 %v1411_v58  ;;  %p1537_p7 = pnand %p1536_p3, %p1530_p8 }
  0x63   : > { %291 = vadd.xlane.f32.xlu0 %v267_v6  ;;  %293 = vadd.xlane.f32.xlu1 %v1800_v7 }
  0x67   : > { %295 = vadd.xlane.f32.xlu0 %v1803_v8  ;;  %297 = vadd.xlane.f32.xlu1 %v1806_v9 }
  0x6b   : > { %299 = vadd.xlane.f32.xlu0 %v1812_v10  ;;  %301 = vadd.xlane.f32.xlu1 %v1815_v11 }
  0x6f   : > { %303 = vadd.xlane.f32.xlu0 %v1820_v12  ;;  %305 = vadd.xlane.f32.xlu1 %v1823_v13 }
  0x73   : > { %307 = vadd.xlane.f32.xlu0 %v1828_v14  ;;  %309 = vadd.xlane.f32.xlu1 %v1831_v15 }
  0xe4   : > { %v280_v20 = vpop.xlane.xlu0 %279  ;;  %v284_v21 = vpop.xlane.xlu1 %283 }
  0xe5   : > { %v312_v22 = vmul.f32 0.0078125, %v280_v20  ;;  %v314_v23 = vmul.f32 0.0078125, %v284_v21 }
  0xe7   : > { %v1835_v24 = vsub.f32 %v261_v0, %v312_v22  ;;  %v1837_v25 = vsub.f32 %v263_v1, %v314_v23  ;;  %v1412_v0 = vld [vmem:[#allocation5 + $0x34] ss:$12 sps:$4 sm:$0xff]  }
  0xe8   : > { %v282_v26 = vpop.xlane.xlu0 %281  ;;  %v286_v27 = vpop.xlane.xlu1 %285  ;;  %v1414_v1 = vld [vmem:[#allocation5 + $0x20] ss:$12 sps:$4 sm:$0xff]   ;;  %689 = vmatprep.subr.bf16.mxu0 %v1412_v0  ;;  %v1419_v22 = vld [vmem:[#allocation5 + $0x48] ss:$12 sps:$4 sm:$0xff]  }
  0xe9   : > { %v313_v28 = vmul.f32 0.0078125, %v282_v26  ;;  %v344_v29 = vmul.f32 %v1835_v24, %v1835_v24  ;;  %v315_v30 = vmul.f32 0.0078125, %v286_v27  ;;  %v346_v33 = vmul.f32 %v1837_v25, %v1837_v25  ;;  %1309 = vmatprep.subr.bf16.mxu1 %v1414_v1 }
  0xea   : > { %1310 = vmatpush3.bf16.msra.mxu1 %v1414_v1 }
  0xeb   : > { %v1841_v31 = vsub.f32 %v262_v2, %v313_v28  ;;  %360 = vadd.xlane.f32.xlu0 %v344_v29  ;;  %v1843_v32 = vsub.f32 %v264_v3, %v315_v30  ;;  %1311 = vmatprep.subr.bf16.mxu1 %v1418_v19  ;;  %v1420_v29 = vld [vmem:[#allocation5 + $0x64] ss:$12 sps:$4 sm:$0xff]  }
  0xec   : > { %v288_v34 = vpop.xlane.xlu0 %287  ;;  %v290_v35 = vpop.xlane.xlu1 %289  ;;  %v1422_v30 = vld [vmem:[#allocation5 + $0x50] ss:$12 sps:$4 sm:$0xff]  }
  0xed   : > { %v316_v36 = vmul.f32 0.0078125, %v288_v34  ;;  %v345_v37 = vmul.f32 %v1841_v31, %v1841_v31  ;;  %v317_v38 = vmul.f32 0.0078125, %v290_v35  ;;  %v347_v41 = vmul.f32 %v1843_v32, %v1843_v32  ;;  %v1426_v35 = vld [vmem:[#allocation5 + $0x68] ss:$12 sps:$4 sm:$0xff]  }
  0xee   : > { %1312 = vmatpush3.bf16.msra.mxu1 %v1418_v19 }
  0xef   : > { %v1849_v39 = vsub.f32 %v265_v4, %v316_v36  ;;  %364 = vadd.xlane.f32.xlu0 %v346_v33  ;;  %362 = vadd.xlane.f32.xlu1 %v345_v37  ;;  %v1851_v40 = vsub.f32 %v266_v5, %v317_v38  ;;  %v1423_v33 = vld [vmem:[#allocation5 + $0x60] ss:$12 sps:$4 sm:$0xff]   ;;  %v1427_v36 = vld [vmem:[#allocation5 + $0x78] ss:$12 sps:$4 sm:$0xff]  }
  0xf0   : > { %v292_v42 = vpop.xlane.xlu0 %291  ;;  %v294_v43 = vpop.xlane.xlu1 %293  ;;  %1313 = vmatprep.subr.bf16.mxu1 %v1422_v30  ;;  %v1428_v37 = vld [vmem:[#allocation5 + $0x94] ss:$12 sps:$4 sm:$0xff]  }
  0xf1   : > { %v318_v44 = vmul.f32 0.0078125, %v292_v42  ;;  %v348_v45 = vmul.f32 %v1849_v39, %v1849_v39  ;;  %v319_v46 = vmul.f32 0.0078125, %v294_v43  ;;  %v349_v49 = vmul.f32 %v1851_v40, %v1851_v40  ;;  %v1430_v38 = vld [vmem:[#allocation5 + $0x80] ss:$12 sps:$4 sm:$0xff]   ;;  %v1434_v43 = vld [vmem:[#allocation5 + $0x98] ss:$12 sps:$4 sm:$0xff]  }
  0xf2   : > { %1314 = vmatpush3.bf16.msra.mxu1 %v1422_v30  ;;  %v1432_v42 = vld [vmem:[#allocation5 + $0xac] ss:$12 sps:$4 sm:$0xff]  }
  0xf3   : > { %v1857_v47 = vsub.f32 %v267_v6, %v318_v44  ;;  %366 = vadd.xlane.f32.xlu1 %v347_v41  ;;  %368 = vadd.xlane.f32.xlu0 %v348_v45  ;;  %v1860_v48 = vsub.f32 %v1800_v7, %v319_v46  ;;  %v1415_v7 = vld [vmem:[#allocation5 + $0x30] ss:$12 sps:$4 sm:$0xff]   ;;  %v1435_v44 = vld [vmem:[#allocation5 + $0xa8] ss:$12 sps:$4 sm:$0xff]   ;;  %v1605_v46 = vmov 0  }
  0xf4   : > { %v296_v50 = vpop.xlane.xlu0 %295  ;;  %v298_v51 = vpop.xlane.xlu1 %297  ;;  %690 = vmatpush1.bf16.msra.mxu0 %v1415_v7  ;;  %1315 = vmatprep.subr.bf16.mxu1 %v1426_v35  ;;  %v1431_v41 = vld [vmem:[#allocation5 + $0x90] ss:$12 sps:$4 sm:$0xff]  }
  0xf5   : > { %v320_v52 = vmul.f32 0.0078125, %v296_v50  ;;  %v350_v53 = vmul.f32 %v1857_v47, %v1857_v47  ;;  %v321_v54 = vmul.f32 0.0078125, %v298_v51  ;;  %v351_v57 = vmul.f32 %v1860_v48, %v1860_v48  ;;  %691 = vmatprep.subr.bf16.mxu0 %v1416_v18  ;;  %v1436_v45 = vld [vmem:[#allocation5 + $0xb0] ss:$12 sps:$4 sm:$0xff]   ;;  %717 = vmatprep.mubr.bf16.mxu0 %v1605_v46 }
  0xf6   : > { %1316 = vmatpush3.bf16.msra.mxu1 %v1426_v35 }
  0xf7   : > { %v1867_v55 = vsub.f32 %v1803_v8, %v320_v52  ;;  %370 = vadd.xlane.f32.xlu1 %v349_v49  ;;  %372 = vadd.xlane.f32.xlu0 %v350_v53  ;;  %v1870_v56 = vsub.f32 %v1806_v9, %v321_v54 }
  0xf8   : > { %v300_v59 = vpop.xlane.xlu0 %299  ;;  %v302_v60 = vpop.xlane.xlu1 %301  ;;  %692 = vmatpush1.bf16.msra.mxu0 %v1419_v22  ;;  %1317 = vmatprep.subr.bf16.mxu1 %v1430_v38  ;;  %v1913_v22 = vld [vmem:[%s2118_s1] ss:$0 sm:$0xff] }
  0xf9   : > { %v322_v61 = vmul.f32 0.0078125, %v300_v59  ;;  %v352_v62 = vmul.f32 %v1867_v55, %v1867_v55  ;;  %v323_v63 = vmul.f32 0.0078125, %v302_v60  ;;  %v353_v4 = vmul.f32 %v1870_v56, %v1870_v56  ;;  %693 = vmatprep.subr.bf16.mxu0 %v1420_v29 }
  0xfa   : > { %1318 = vmatpush3.bf16.msra.mxu1 %v1430_v38 }
  0xfb   : > { %v1877_v2 = vsub.f32 %v1812_v10, %v322_v61  ;;  %374 = vadd.xlane.f32.xlu1 %v351_v57  ;;  %376 = vadd.xlane.f32.xlu0 %v352_v62  ;;  %v1880_v3 = vsub.f32 %v1815_v11, %v323_v63 }
  0xfc   : > { %v304_v5 = vpop.xlane.xlu0 %303  ;;  %v306_v6 = vpop.xlane.xlu1 %305  ;;  %694 = vmatpush1.bf16.msra.mxu0 %v1423_v33  ;;  %1319 = vmatprep.subr.bf16.mxu1 %v1434_v43 }
  0xfd   : > { %v324_v8 = vmul.f32 0.0078125, %v304_v5  ;;  %v354_v9 = vmul.f32 %v1877_v2, %v1877_v2  ;;  %v325_v16 = vmul.f32 0.0078125, %v306_v6  ;;  %v355_v17 = vmul.f32 %v1880_v3, %v1880_v3 }
  0xfe   : > { %1320 = vmatpush3.bf16.msra.mxu1 %v1434_v43 }
  0xff   : > { %v1887_v10 = vsub.f32 %v1820_v12, %v324_v8  ;;  %378 = vadd.xlane.f32.xlu1 %v353_v4  ;;  %380 = vadd.xlane.f32.xlu0 %v354_v9  ;;  %v1890_v11 = vsub.f32 %v1823_v13, %v325_v16 }
 0x100   : > { %v308_v20 = vpop.xlane.xlu0 %307  ;;  %v310_v21 = vpop.xlane.xlu1 %309  ;;  %1321 = vmatprep.subr.bf16.mxu1 %v1436_v45 }
 0x101   : > { %v326_v23 = vmul.f32 0.0078125, %v308_v20  ;;  %v356_v26 = vmul.f32 %v1887_v10, %v1887_v10  ;;  %v327_v27 = vmul.f32 0.0078125, %v310_v21  ;;  %v357_v28 = vmul.f32 %v1890_v11, %v1890_v11 }
 0x102   : > { %1322 = vmatpush3.bf16.msra.mxu1 %v1436_v45 }
 0x103   : > { %v1897_v12 = vsub.f32 %v1828_v14, %v326_v23  ;;  %382 = vadd.xlane.f32.xlu1 %v355_v17  ;;  %384 = vadd.xlane.f32.xlu0 %v356_v26  ;;  %v1900_v13 = vsub.f32 %v1831_v15, %v327_v27  ;;  %v1424_v15 = vld [vmem:[#allocation5 + $0x7c] ss:$12 sps:$4 sm:$0xff]  }
 0x104   : > { %695 = vmatprep.subr.bf16.mxu0 %v1424_v15  ;;  %v1920_v15 = vld [vmem:[%s2119_s2] ss:$0 sm:$0xff] }
 0x105   : > { %v358_v34 = vmul.f32 %v1897_v12, %v1897_v12  ;;  %v359_v14 = vmul.f32 %v1900_v13, %v1900_v13  ;;  %696 = vmatpush1.bf16.msra.mxu0 %v1427_v36 }
 0x106   : > { %697 = vmatprep.subr.bf16.mxu0 %v1428_v37 }
 0x107   : > { %386 = vadd.xlane.f32.xlu1 %v357_v28  ;;  %388 = vadd.xlane.f32.xlu0 %v358_v34 }
 0x109   : > { %698 = vmatpush1.bf16.msra.mxu0 %v1431_v41 }
 0x10a   : > { %699 = vmatprep.subr.bf16.mxu0 %v1432_v42 }
 0x10b   : > { %390 = vadd.xlane.f32.xlu1 %v359_v14 }
 0x10d   : > { %700 = vmatpush1.bf16.msra.mxu0 %v1435_v44 }
 0x178   : > { %v361_v49 = vpop.xlane.xlu0 %360 }
 0x179   : > { %v392_v50 = vmul.f32 0.0078125, %v361_v49 }
 0x17b   : > { %v408_v51 = vadd.f32 1e-05, %v392_v50 }
 0x17c   : > { %v363_v52 = vpop.xlane.xlu1 %362  ;;  %v365_v53 = vpop.xlane.xlu0 %364 }
 0x17d   : > { %1437 = vrsqrt.f32 %v408_v51  ;;  %v393_v54 = vmul.f32 0.0078125, %v363_v52  ;;  %v394_v57 = vmul.f32 0.0078125, %v365_v53 }
 0x17f   : > { %v409_v58 = vadd.f32 1e-05, %v393_v54  ;;  %v410_v59 = vadd.f32 1e-05, %v394_v57 }
 0x180   : > { %v367_v60 = vpop.xlane.xlu1 %366  ;;  %v369_v61 = vpop.xlane.xlu0 %368 }
 0x181   : > { %1439 = vrsqrt.f32 %v409_v58  ;;  %v395_v62 = vmul.f32 0.0078125, %v367_v60  ;;  %v396_v63 = vmul.f32 0.0078125, %v369_v61 }
 0x182   : > { %1441 = vrsqrt.f32 %v410_v59 }
 0x183   : > { %v411_v0 = vadd.f32 1e-05, %v395_v62  ;;  %v412_v1 = vadd.f32 1e-05, %v396_v63 }
 0x184   : > { %v371_v4 = vpop.xlane.xlu1 %370  ;;  %v373_v5 = vpop.xlane.xlu0 %372 }
 0x185   : > { %1443 = vrsqrt.f32 %v411_v0  ;;  %v397_v6 = vmul.f32 0.0078125, %v371_v4  ;;  %v398_v7 = vmul.f32 0.0078125, %v373_v5 }
 0x186   : > { %1445 = vrsqrt.f32 %v412_v1 }
 0x187   : > { %v1438_v8 = vpop.eup %1437  ;;  %v413_v9 = vadd.f32 1e-05, %v397_v6  ;;  %v414_v16 = vadd.f32 1e-05, %v398_v7 }
 0x188   : > { %v375_v17 = vpop.xlane.xlu1 %374  ;;  %v377_v18 = vpop.xlane.xlu0 %376  ;;  %v440_v19 = vmul.f32 %v1438_v8, %v1835_v24 }
 0x189   : > { %1447 = vrsqrt.f32 %v413_v9  ;;  %v399_v20 = vmul.f32 0.0078125, %v375_v17  ;;  %v400_v21 = vmul.f32 0.0078125, %v377_v18 }
 0x18a   : > { %1449 = vrsqrt.f32 %v414_v16  ;;  %v462_v34 = vmul.f32 %v1913_v22, %v440_v19 }
 0x18b   : > { %v1440_v23 = vpop.eup %1439  ;;  %v415_v26 = vadd.f32 1e-05, %v399_v20  ;;  %v416_v27 = vadd.f32 1e-05, %v400_v21 }
 0x18c   : > { %v1442_v28 = vpop.eup %1441  ;;  %v379_v29 = vpop.xlane.xlu1 %378  ;;  %v441_v33 = vmul.f32 %v1440_v23, %v1841_v31  ;;  %v484_v45 = vadd.f32 %v1920_v15, %v462_v34 }
 0x18d   : > { %v381_v30 = vpop.xlane.xlu0 %380  ;;  %1451 = vrsqrt.f32 %v415_v26  ;;  %v401_v24 = vmul.f32 0.0078125, %v379_v29  ;;  %v442_v35 = vmul.f32 %v1442_v28, %v1837_v25 }
 0x18e   : > { %v402_v14 = vmul.f32 0.0078125, %v381_v30  ;;  %1453 = vrsqrt.f32 %v416_v27  ;;  %v463_v36 = vmul.f32 %v1913_v22, %v441_v33 }
 0x18f   : > { %v1444_v37 = vpop.eup %1443  ;;  %v417_v38 = vadd.f32 1e-05, %v401_v24  ;;  %v464_v31 = vmul.f32 %v1913_v22, %v442_v35 }
 0x190   : > { %v418_v41 = vadd.f32 1e-05, %v402_v14  ;;  %v1446_v42 = vpop.eup %1445  ;;  %v383_v43 = vpop.xlane.xlu1 %382  ;;  %v485_v49 = vadd.f32 %v1920_v15, %v463_v36  ;;  %v443_v50 = vmul.f32 %v1444_v37, %v1843_v32 }
 0x191   : > { %v385_v44 = vpop.xlane.xlu0 %384  ;;  %1455 = vrsqrt.f32 %v417_v38  ;;  %v403_v51 = vmul.f32 0.0078125, %v383_v43  ;;  %v444_v54 = vmul.f32 %v1446_v42, %v1849_v39  ;;  %v486_v60 = vadd.f32 %v1920_v15, %v464_v31 }
 0x192   : > { %v404_v25 = vmul.f32 0.0078125, %v385_v44  ;;  %1457 = vrsqrt.f32 %v418_v41  ;;  %v500_v52 = vpack.c.bf16 %v485_v49, %v484_v45  ;;  %v465_v53 = vmul.f32 %v1913_v22, %v443_v50 }
 0x193   : > { %v1448_v57 = vpop.eup %1447  ;;  %v419_v58 = vadd.f32 1e-05, %v403_v51  ;;  %v466_v1 = vmul.f32 %v1913_v22, %v444_v54 }
 0x194   : > { %v420_v59 = vadd.f32 1e-05, %v404_v25  ;;  %v1450_v61 = vpop.eup %1449  ;;  %v387_v62 = vpop.xlane.xlu1 %386  ;;  %718 = vmatmul.mubr.bf16.vlgmr.msra.gmra.mrb[0].mxu0 %v500_v52  ;;  %1323 = vmatprep.mubr.bf16.mxu1 %v500_v52  ;;  %v487_v32 = vadd.f32 %v1920_v15, %v465_v53  ;;  %v445_v0 = vmul.f32 %v1448_v57, %v1851_v40 }
 0x195   : > { %v389_v63 = vpop.xlane.xlu0 %388  ;;  %1459 = vrsqrt.f32 %v419_v58  ;;  %v405_v4 = vmul.f32 0.0078125, %v387_v62  ;;  %727 = vmatprep.mubr.bf16.mxu0 %v1605_v46  ;;  %v446_v39 = vmul.f32 %v1450_v61, %v1857_v47  ;;  %v488_v19 = vadd.f32 %v1920_v15, %v466_v1 }
 0x196   : > { %v406_v5 = vmul.f32 0.0078125, %v389_v63  ;;  %1461 = vrsqrt.f32 %v420_v59  ;;  %v501_v6 = vpack.c.bf16 %v487_v32, %v486_v60  ;;  %v467_v7 = vmul.f32 %v1913_v22, %v445_v0 }
 0x197   : > { %v1452_v8 = vpop.eup %1451  ;;  %v421_v9 = vadd.f32 1e-05, %v405_v4  ;;  %v468_v17 = vmul.f32 %v1913_v22, %v446_v39 }
 0x198   : > { %v422_v16 = vadd.f32 1e-05, %v406_v5  ;;  %v1454_v18 = vpop.eup %1453  ;;  %v391_v40 = vpop.xlane.xlu1 %390  ;;  %1324 = vmatmul.mubr.bf16.vlgmr.msra.gmra.mrb[0].mxu1 %v501_v6  ;;  %v489_v20 = vadd.f32 %v1920_v15, %v467_v7  ;;  %v447_v21 = vmul.f32 %v1452_v8, %v1860_v48 }
 0x199   : > { %1463 = vrsqrt.f32 %v421_v9  ;;  %v407_v47 = vmul.f32 0.0078125, %v391_v40  ;;  %v448_v23 = vmul.f32 %v1454_v18, %v1867_v55  ;;  %v490_v30 = vadd.f32 %v1920_v15, %v468_v17 }
 0x19a   : > { %1465 = vrsqrt.f32 %v422_v16  ;;  %v502_v26 = vpack.c.bf16 %v489_v20, %v488_v19  ;;  %v469_v27 = vmul.f32 %v1913_v22, %v447_v21 }
 0x19b   : > { %v1456_v28 = vpop.eup %1455  ;;  %v423_v29 = vadd.f32 1e-05, %v407_v47  ;;  %v470_v48 = vmul.f32 %v1913_v22, %v448_v23 }
 0x19c   : > { %v1458_v33 = vpop.eup %1457  ;;  %728 = vmatmul.mubr.bf16.gmra.mrb[4].mxu0 %v501_v6  ;;  %1327 = vmatprep.mubr.bf16.mxu1 %v502_v26  ;;  %v491_v34 = vadd.f32 %v1920_v15, %v469_v27  ;;  %v449_v24 = vmul.f32 %v1456_v28, %v1870_v56 }
 0x19d   : > { %1467 = vrsqrt.f32 %v423_v29  ;;  %737 = vmatprep.mubr.bf16.mxu0 %v1605_v46  ;;  %v450_v55 = vmul.f32 %v1458_v33, %v1877_v2  ;;  %v492_v41 = vadd.f32 %v1920_v15, %v470_v48 }
 0x19e   : > { %v503_v14 = vpack.c.bf16 %v491_v34, %v490_v30  ;;  %v471_v35 = vmul.f32 %v1913_v22, %v449_v24 }
 0x19f   : > { %v1460_v36 = vpop.eup %1459  ;;  %v472_v37 = vmul.f32 %v1913_v22, %v450_v55 }
 0x1a0   : > { %v1462_v38 = vpop.eup %1461  ;;  %1328 = vmatmul.mubr.bf16.gmra.mrb[4].mxu1 %v503_v14  ;;  %v493_v31 = vadd.f32 %v1920_v15, %v471_v35  ;;  %v451_v56 = vmul.f32 %v1460_v36, %v1880_v3 }
 0x1a1   : > { %v452_v42 = vmul.f32 %v1462_v38, %v1887_v10  ;;  %v494_v45 = vadd.f32 %v1920_v15, %v472_v37 }
 0x1a2   : > { %v504_v43 = vpack.c.bf16 %v493_v31, %v492_v41  ;;  %v473_v44 = vmul.f32 %v1913_v22, %v451_v56 }
 0x1a3   : > { %v1464_v2 = vpop.eup %1463  ;;  %v474_v25 = vmul.f32 %v1913_v22, %v452_v42 }
 0x1a4   : > { %v1466_v49 = vpop.eup %1465  ;;  %738 = vmatmul.mubr.bf16.gmra.mrb[8].mxu0 %v502_v26  ;;  %1331 = vmatprep.mubr.bf16.mxu1 %v504_v43  ;;  %v495_v50 = vadd.f32 %v1920_v15, %v473_v44  ;;  %v453_v51 = vmul.f32 %v1464_v2, %v1890_v11 }
 0x1a5   : > { %747 = vmatprep.mubr.bf16.mxu0 %v1605_v46  ;;  %v454_v3 = vmul.f32 %v1466_v49, %v1897_v12  ;;  %v496_v54 = vadd.f32 %v1920_v15, %v474_v25 }
 0x1a6   : > { %v505_v10 = vpack.c.bf16 %v495_v50, %v494_v45  ;;  %v475_v52 = vmul.f32 %v1913_v22, %v453_v51 }
 0x1a7   : > { %v1468_v53 = vpop.eup %1467  ;;  %v476_v59 = vmul.f32 %v1913_v22, %v454_v3 }
 0x1a8   : > { %1332 = vmatmul.mubr.bf16.gmra.mrb[8].mxu1 %v505_v10  ;;  %v497_v57 = vadd.f32 %v1920_v15, %v475_v52  ;;  %v455_v58 = vmul.f32 %v1468_v53, %v1900_v13  ;;  %v542_v13 = vlaneseq }
 0x1a9   : > { %v498_v12 = vadd.f32 %v1920_v15, %v476_v59 }
 0x1aa   : > { %v506_v11 = vpack.c.bf16 %v497_v57, %v496_v54  ;;  %v477_v60 = vmul.f32 %v1913_v22, %v455_v58  ;;  %v543_v22 = vshrl.u32 %v542_v13, 7 }
 0x1ac   : > { %748 = vmatmul.mubr.bf16.gmra.mrb[12].mxu0 %v503_v14  ;;  %1335 = vmatprep.mubr.bf16.mxu1 %v506_v11  ;;  %v499_v61 = vadd.f32 %v1920_v15, %v477_v60  ;;  %v544_v63 = vsub.s32 0, %v543_v22  ;;  %v540_v15 = vld [vmem:[%s2121_s4] sm:$0x7]  ;;  %v548_v32 = vsub.s32 1, %v543_v22  ;;  %v552_v1 = vsub.s32 2, %v543_v22 }
 0x1ad   : > { %757 = vmatprep.mubr.bf16.mxu0 %v1605_v46 }
 0x1ae   : > { %v507_v62 = vpack.c.bf16 %v499_v61, %v498_v12  ;;  %v1977_v0 = vrot.slane %v540_v15, %v544_v63  ;;  %v1979_v4 = vrot.slane %v540_v15, %v548_v32 }
 0x1b0   : > { %1336 = vmatmul.mubr.bf16.gmra.mrb[12].mxu1 %v507_v62 }
 0x1b4   : > { %758 = vmatmul.mubr.bf16.gmra.mrb[16].mxu0 %v504_v43 }
 0x1b5   : > { %767 = vmatprep.mubr.bf16.mxu0 %v1605_v46 }
 0x1bc   : > { %768 = vmatmul.mubr.bf16.gmra.mrb[20].mxu0 %v505_v10 }
 0x1bd   : > { %777 = vmatprep.mubr.bf16.mxu0 %v1605_v46 }
 0x1c4   : > { %778 = vmatmul.mubr.bf16.gmra.mrb[24].mxu0 %v506_v11 }
 0x1c5   : > { %787 = vmatprep.mubr.bf16.mxu0 %v1605_v46  ;;  %v1983_v46 = vrot.slane %v540_v15, %v552_v1 }
 0x1cc   : > { %788 = vmatmul.mubr.bf16.gmra.mrb[28].mxu0 %v507_v62 }
 0x267   : > { %v719_v5 = vpop.f32.mrb[0].mxu0 }
 0x268   : > { %v720_v39 = vadd.f32 %v719_v5, %v1977_v0  ;;  %v721_v6 = vpop.f32.mrb[1].mxu0 }
 0x269   : > { %v722_v7 = vadd.f32 %v721_v6, %v1979_v4  ;;  %v723_v8 = vpop.f32.mrb[2].mxu0 }
 0x26a   : > { %v724_v9 = vadd.f32 %v723_v8, %v1977_v0  ;;  %v725_v16 = vpop.f32.mrb[3].mxu0 }
 0x26b   : > { %v1259_v17 = vpack.c.bf16 %v722_v7, %v720_v39  ;;  %v726_v18 = vadd.f32 %v725_v16, %v1979_v4  ;;  %v1325_v40 = vpop.f32.mrb[0].mxu1 }
 0x26c   : > { %v841_v19 = vadd.f32 %v1325_v40, %v1983_v46  ;;  %v832_v20 = vpop.f32.mrb[1].mxu1 }
 0x26d   : > { %1055 = vst [vmem:[%s1989_s29] sm:$0xff] %v1259_v17  ;;  %v1261_v21 = vpack.c.bf16 %v726_v18, %v724_v9  ;;  %v833_v47 = vadd.f32 %v832_v20, %v1983_v46  ;;  %v1326_v23 = vpop.f32.mrb[2].mxu1 }
 0x26e   : > { %v1264_v26 = vpack.c.bf16 %v841_v19, %v841_v19  ;;  %v844_v27 = vadd.f32 %v1326_v23, %v1983_v46  ;;  %v835_v28 = vpop.f32.mrb[3].mxu1 }
 0x26f   : > { %1057 = vst [vmem:[%s1989_s29 + $0xc] sm:$0xff] %v1261_v21  ;;  %v1260_v29 = vpack.c.bf16 %v833_v47, %v833_v47  ;;  %v836_v30 = vadd.f32 %v835_v28, %v1983_v46  ;;  %v729_v33 = vpop.f32.mrb[4].mxu0 }
 0x270   : > { %1060 = vst [vmem:[%s1989_s29 + $0x20] sm:$0xf] %v1264_v26  ;;  %v1266_v34 = vpack.c.bf16 %v844_v27, %v844_v27  ;;  %v730_v24 = vadd.f32 %v729_v33, %v1977_v0  ;;  %v731_v48 = vpop.f32.mrb[5].mxu0 }
 0x271   : > { %1056 = vst [vmem:[%s1989_s29 + $0x8] sm:$0xf] %v1260_v29  ;;  %v1262_v55 = vpack.c.bf16 %v836_v30, %v836_v30  ;;  %v732_v14 = vadd.f32 %v731_v48, %v1979_v4  ;;  %v733_v35 = vpop.f32.mrb[6].mxu0 }
 0x272   : > { %1062 = vst [vmem:[%s1989_s29 + $0x2c] sm:$0xf] %v1266_v34  ;;  %v734_v36 = vadd.f32 %v733_v35, %v1977_v0  ;;  %v735_v37 = vpop.f32.mrb[7].mxu0 }
 0x273   : > { %1058 = vst [vmem:[%s1989_s29 + $0x14] sm:$0xf] %v1262_v55  ;;  %v1263_v38 = vpack.c.bf16 %v732_v14, %v730_v24  ;;  %v736_v41 = vadd.f32 %v735_v37, %v1979_v4  ;;  %v1329_v31 = vpop.f32.mrb[4].mxu1 }
 0x274   : > { %v857_v56 = vadd.f32 %v1329_v31, %v1983_v46  ;;  %v848_v42 = vpop.f32.mrb[5].mxu1 }
 0x275   : > { %1059 = vst [vmem:[%s1989_s29 + $0x18] sm:$0xff] %v1263_v38  ;;  %v1265_v43 = vpack.c.bf16 %v736_v41, %v734_v36  ;;  %v849_v44 = vadd.f32 %v848_v42, %v1983_v46  ;;  %v1330_v2 = vpop.f32.mrb[6].mxu1 }
 0x276   : > { %v1272_v45 = vpack.c.bf16 %v857_v56, %v857_v56  ;;  %v860_v49 = vadd.f32 %v1330_v2, %v1983_v46  ;;  %v851_v50 = vpop.f32.mrb[7].mxu1 }
 0x277   : > { %1061 = vst [vmem:[%s1989_s29 + $0x24] sm:$0xff] %v1265_v43  ;;  %v1268_v51 = vpack.c.bf16 %v849_v44, %v849_v44  ;;  %v852_v25 = vadd.f32 %v851_v50, %v1983_v46  ;;  %v739_v3 = vpop.f32.mrb[8].mxu0 }
 0x278   : > { %1068 = vst [vmem:[%s1989_s29 + $0x50] sm:$0xf] %v1272_v45  ;;  %v1274_v10 = vpack.c.bf16 %v860_v49, %v860_v49  ;;  %v740_v52 = vadd.f32 %v739_v3, %v1977_v0  ;;  %v741_v53 = vpop.f32.mrb[9].mxu0 }
 0x279   : > { %1064 = vst [vmem:[%s1989_s29 + $0x38] sm:$0xf] %v1268_v51  ;;  %v1270_v54 = vpack.c.bf16 %v852_v25, %v852_v25  ;;  %v742_v57 = vadd.f32 %v741_v53, %v1979_v4  ;;  %v743_v58 = vpop.f32.mrb[10].mxu0 }
 0x27a   : > { %1070 = vst [vmem:[%s1989_s29 + $0x5c] sm:$0xf] %v1274_v10  ;;  %v744_v59 = vadd.f32 %v743_v58, %v1977_v0  ;;  %v745_v11 = vpop.f32.mrb[11].mxu0 }
 0x27b   : > { %1066 = vst [vmem:[%s1989_s29 + $0x44] sm:$0xf] %v1270_v54  ;;  %v1267_v60 = vpack.c.bf16 %v742_v57, %v740_v52  ;;  %v746_v12 = vadd.f32 %v745_v11, %v1979_v4  ;;  %v1333_v61 = vpop.f32.mrb[8].mxu1 }
 0x27c   : > { %v873_v62 = vadd.f32 %v1333_v61, %v1983_v46  ;;  %v864_v13 = vpop.f32.mrb[9].mxu1 }
 0x27d   : > { %1063 = vst [vmem:[%s1989_s29 + $0x30] sm:$0xff] %v1267_v60  ;;  %v1269_v22 = vpack.c.bf16 %v746_v12, %v744_v59  ;;  %v865_v63 = vadd.f32 %v864_v13, %v1983_v46  ;;  %v1334_v15 = vpop.f32.mrb[10].mxu1 }
 0x27e   : > { %v1280_v32 = vpack.c.bf16 %v873_v62, %v873_v62  ;;  %v876_v1 = vadd.f32 %v1334_v15, %v1983_v46  ;;  %v867_v5 = vpop.f32.mrb[11].mxu1 }
 0x27f   : > { %1065 = vst [vmem:[%s1989_s29 + $0x3c] sm:$0xff] %v1269_v22  ;;  %v1276_v39 = vpack.c.bf16 %v865_v63, %v865_v63  ;;  %v868_v6 = vadd.f32 %v867_v5, %v1983_v46  ;;  %v749_v7 = vpop.f32.mrb[12].mxu0 }
 0x280   : > { %1076 = vst [vmem:[%s1989_s29 + $0x80] sm:$0xf] %v1280_v32  ;;  %v1282_v8 = vpack.c.bf16 %v876_v1, %v876_v1  ;;  %v750_v9 = vadd.f32 %v749_v7, %v1977_v0  ;;  %v751_v16 = vpop.f32.mrb[13].mxu0 }
 0x281   : > { %1072 = vst [vmem:[%s1989_s29 + $0x68] sm:$0xf] %v1276_v39  ;;  %v1278_v17 = vpack.c.bf16 %v868_v6, %v868_v6  ;;  %v752_v18 = vadd.f32 %v751_v16, %v1979_v4  ;;  %v753_v40 = vpop.f32.mrb[14].mxu0 }
 0x282   : > { %1078 = vst [vmem:[%s1989_s29 + $0x8c] sm:$0xf] %v1282_v8  ;;  %v754_v19 = vadd.f32 %v753_v40, %v1977_v0  ;;  %v755_v20 = vpop.f32.mrb[15].mxu0 }
 0x283   : > { %1074 = vst [vmem:[%s1989_s29 + $0x74] sm:$0xf] %v1278_v17  ;;  %v1271_v21 = vpack.c.bf16 %v752_v18, %v750_v9  ;;  %v756_v47 = vadd.f32 %v755_v20, %v1979_v4  ;;  %v1337_v23 = vpop.f32.mrb[12].mxu1 }
 0x284   : > { %v889_v26 = vadd.f32 %v1337_v23, %v1983_v46  ;;  %v880_v27 = vpop.f32.mrb[13].mxu1 }
 0x285   : > { %1067 = vst [vmem:[%s1989_s29 + $0x48] sm:$0xff] %v1271_v21  ;;  %v1273_v28 = vpack.c.bf16 %v756_v47, %v754_v19  ;;  %v881_v29 = vadd.f32 %v880_v27, %v1983_v46  ;;  %v1338_v30 = vpop.f32.mrb[14].mxu1 }
 0x286   : > { %v1288_v33 = vpack.c.bf16 %v889_v26, %v889_v26  ;;  %v892_v34 = vadd.f32 %v1338_v30, %v1983_v46  ;;  %v883_v24 = vpop.f32.mrb[15].mxu1 }
 0x287   : > { %1069 = vst [vmem:[%s1989_s29 + $0x54] sm:$0xff] %v1273_v28  ;;  %v1284_v48 = vpack.c.bf16 %v881_v29, %v881_v29  ;;  %v884_v55 = vadd.f32 %v883_v24, %v1983_v46  ;;  %v759_v14 = vpop.f32.mrb[16].mxu0 }
 0x288   : > { %1084 = vst [vmem:[%s1989_s29 + $0xb0] sm:$0xf] %v1288_v33  ;;  %v1290_v35 = vpack.c.bf16 %v892_v34, %v892_v34  ;;  %v760_v36 = vadd.f32 %v759_v14, %v1977_v0  ;;  %v761_v37 = vpop.f32.mrb[17].mxu0 }
 0x289   : > { %1080 = vst [vmem:[%s1989_s29 + $0x98] sm:$0xf] %v1284_v48  ;;  %v1286_v38 = vpack.c.bf16 %v884_v55, %v884_v55  ;;  %v762_v41 = vadd.f32 %v761_v37, %v1979_v4  ;;  %v763_v31 = vpop.f32.mrb[18].mxu0 }
 0x28a   : > { %1086 = vst [vmem:[%s1989_s29 + $0xbc] sm:$0xf] %v1290_v35  ;;  %v764_v56 = vadd.f32 %v763_v31, %v1977_v0  ;;  %v765_v42 = vpop.f32.mrb[19].mxu0 }
 0x28b   : > { %1082 = vst [vmem:[%s1989_s29 + $0xa4] sm:$0xf] %v1286_v38  ;;  %v1275_v46 = vpack.c.bf16 %v762_v41, %v760_v36  ;;  %v766_v43 = vadd.f32 %v765_v42, %v1979_v4 }
 0x28d   : > { %1071 = vst [vmem:[%s1989_s29 + $0x60] sm:$0xff] %v1275_v46  ;;  %v1277_v44 = vpack.c.bf16 %v766_v43, %v764_v56 }
 0x28f   : > { %1073 = vst [vmem:[%s1989_s29 + $0x6c] sm:$0xff] %v1277_v44  ;;  %v769_v2 = vpop.f32.mrb[20].mxu0 }
 0x290   : > { %v770_v45 = vadd.f32 %v769_v2, %v1977_v0  ;;  %v771_v49 = vpop.f32.mrb[21].mxu0 }
 0x291   : > { %v772_v50 = vadd.f32 %v771_v49, %v1979_v4  ;;  %v773_v51 = vpop.f32.mrb[22].mxu0 }
 0x292   : > { %v774_v25 = vadd.f32 %v773_v51, %v1977_v0  ;;  %v775_v3 = vpop.f32.mrb[23].mxu0 }
 0x293   : > { %v1279_v10 = vpack.c.bf16 %v772_v50, %v770_v45  ;;  %v776_v52 = vadd.f32 %v775_v3, %v1979_v4 }
 0x295   : > { %1075 = vst [vmem:[%s1989_s29 + $0x78] sm:$0xff] %v1279_v10  ;;  %v1281_v53 = vpack.c.bf16 %v776_v52, %v774_v25 }
 0x297   : > { %1077 = vst [vmem:[%s1989_s29 + $0x84] sm:$0xff] %v1281_v53  ;;  %v779_v54 = vpop.f32.mrb[24].mxu0 }
 0x298   : > { %v780_v57 = vadd.f32 %v779_v54, %v1977_v0  ;;  %v781_v58 = vpop.f32.mrb[25].mxu0 }
 0x299   : > { %v782_v59 = vadd.f32 %v781_v58, %v1979_v4  ;;  %v783_v11 = vpop.f32.mrb[26].mxu0 }
 0x29a   : > { %v784_v60 = vadd.f32 %v783_v11, %v1977_v0  ;;  %v785_v12 = vpop.f32.mrb[27].mxu0 }
 0x29b   : > { %v1283_v61 = vpack.c.bf16 %v782_v59, %v780_v57  ;;  %v786_v62 = vadd.f32 %v785_v12, %v1979_v4 }
 0x29d   : > { %1079 = vst [vmem:[%s1989_s29 + $0x90] sm:$0xff] %v1283_v61  ;;  %v1285_v13 = vpack.c.bf16 %v786_v62, %v784_v60 }
 0x29f   : > { %1081 = vst [vmem:[%s1989_s29 + $0x9c] sm:$0xff] %v1285_v13  ;;  %v789_v22 = vpop.f32.mrb[28].mxu0 }
 0x2a0   : > { %v790_v63 = vadd.f32 %v789_v22, %v1977_v0  ;;  %v791_v15 = vpop.f32.mrb[29].mxu0 }
 0x2a1   : > { %v792_v32 = vadd.f32 %v791_v15, %v1979_v4  ;;  %v793_v1 = vpop.f32.mrb[30].mxu0 }
 0x2a2   : > { %v794_v5 = vadd.f32 %v793_v1, %v1977_v0  ;;  %v795_v39 = vpop.f32.mrb[31].mxu0 }
 0x2a3   : > { %v1287_v6 = vpack.c.bf16 %v792_v32, %v790_v63  ;;  %v796_v7 = vadd.f32 %v795_v39, %v1979_v4 }
 0x2a5   : > { %1083 = vst [vmem:[%s1989_s29 + $0xa8] sm:$0xff] %v1287_v6  ;;  %v1289_v8 = vpack.c.bf16 %v796_v7, %v794_v5 }
 0x2a7   : > { %1085 = vst [vmem:[%s1989_s29 + $0xb4] sm:$0xff] %v1289_v8 }
 0x2a8   : > { %1540 = shalt.err (!%p1537_p7)
}
 0x2a9   : > { %s1541_s14 = scalar_lea.hbm %s2069_s27, 3072  ;;  %s1545_s15 = scalar_lea.hbm %s2122_s5, 6144 }
 0x2aa   : > { %p1542_p9 = scmp.ne.s32.totalorder %s2069_s27, %s1541_s14  ;;  %p1546_p5 = scmp.lt.u32.totalorder %s2069_s27, %s2122_s5 }
 0x2ab   : > { %p1547_p11 = scmp.lt.u32.totalorder %s1545_s15, %s1541_s14  ;;  %p1549_p4 = scmp.lt.u32.totalorder %s1541_s14, %s2069_s27 }
 0x2ac   : > { %p1543_p2 = pnand %p1542_p9, %p1730_p12 }
 0x2ad   : > { %p1548_p1 = por %p1547_p11, %p1546_p5 }
 0x2ae   : > { %p1544_p0 = pneg %p1543_p2 }
 0x2af   : > { %p1550_p6 = por %p1549_p4, %p1548_p1 }
 0x2b1   : > { %p1551_p8 = pnand %p1550_p6, %p1544_p0 }
 0x2b3   : > { %1554 = shalt.err (!%p1551_p8)
}
 0x2b4   : > { %s1607_s13 = smov 192   ;;  %s1608_s16 = smov 12  }
 0x2b5   : > { %1347 = dma.vmem_to_hbm [thread:$0]  (%p1730_p12), %s2072_s28, 3072, %s2069_s27, %s1088_s22, %s1607_s13, %s1607_s13, %s1608_s16  }
 0x2b6 PF: > { %s1117_s17 = sand.u32 1, %s1585_s18   ;;  %p2137_p10 = scmp.ne.s32.totalorder %s2127_s25, 0 }
 0x2b7   : > { %p2138_p13 = scmp.ge.s32.totalorder %s1597_s21, 2  ;;  %s1118_s11 = scalar_lea.sflag [#allocation4], %s1117_s17 }
 0x2b9   : > { %p1358_p3 = pnand %p2138_p13, %p2137_p10 }
 0x2bb   : > { %1580 = dma.done.wait (!%p1358_p3), %s1118_s11, 3072  }
 0x2bc   : > { %1582 = vsyncadd (!%p1358_p3), %s1118_s11, 4294964224  ;;  %p19_p7 = scmp.ge.s32.totalorder %s1695_s30, 4   ;;  %s2139_s18 = smov %s1589_s19 }
 0x2bd   : > { %s2140_s19 = smov %s1593_s20  ;;  %s2141_s20 = smov %s1726_s8 }
 0x2be   : > { %s2142_s21 = smov %s1695_s30  ;;  %21 = sbr.rel (!%p19_p7) target bundleno = 6 (0x6), region = 89 }
 0x2c5   :  { %1123 = vsyncpa [#allocation3], 1 }
 0x2c6   :  { %1125 = vsyncpa [#allocation3 + $0x1], 1 }
 0x2c7   :  { %1126 = vsyncpa [#allocation6], 1 }
 0x2c8   :  { %1127 = vsyncpa [#allocation4], 1 }
 0x2c9   :  { %1129 = vsyncpa [#allocation4 + $0x1], 1 }

</bundles_post_ra>
